<compile_context>
chip_gen: v7x
topology: tpu7x:2x2x1
jax: 0.10.0
libtpu: 0.0.40
codegen_flags: <defaults>
</compile_context>

<pallas_src>
import numpy as np
import jax
import jax.numpy as jnp
from jax import lax
from jax.experimental import pallas as pl
from jax.experimental.pallas import tpu as pltpu


def _banded_weight_np(w_kw_ci_co, win, wout, off=0):
    """(K, Ci, Co) taps -> (win*Ci, wout*Co) banded (block-Toeplitz) matrix.

    M[wi*Ci+ci, wo*Co+co] = w[wi - wo + off, ci, co] when that tap index lies
    in [0, K); input columns outside [0, win) are implicitly zero padding.
    Built once per model with numpy (hoisted out of the per-call path).
    """
    K, Ci, Co = w_kw_ci_co.shape
    m = np.zeros((win, Ci, wout, Co), np.float32)
    for wi in range(win):
        for wo in range(wout):
            kw = wi - wo + off
            if 0 <= kw < K:
                m[wi, :, wo, :] = w_kw_ci_co[kw]
    return m.reshape(win * Ci, wout * Co)


def _make_kernel(Bt, H, W, Cin, Cout, K, MP):
    P = (K - 1) // 2
    Hp, Wp = H + 2 * P, W + 2 * P        # input padded by P
    He = H + 2 * P                       # conv1 activation incl. zero H-halo
    Ho = H // MP                         # floor-mode pool output rows
    NL = W * Cout                        # lane width of every activation

    def kernel(x_ref, w1_ref, b1_ref, w2_ref, b2_ref, out_ref, y1s_ref):
        # x_ref  : (Bt, Hp, Wp*Cin)  bf16  input padded by P; W & C fused in lanes
        # w1_ref : (K, Wp*Cin, NL)   bf16  banded conv1 weights (one per kh tap)
        # b1_ref : (1, NL)           f32
        # w2_ref : (K, NL, NL)       bf16  banded conv2 weights (band offset P)
        # b2_ref : (1, NL)           f32
        # out_ref: (Bt, Ho, NL)      f32   pooled value at lane (wo*MP)*Cout+co
        # y1s_ref: (Bt, He, NL)      bf16  relu(conv1) with zero H-halo rows

        # ---- conv1 (+bias, ReLU): K banded MXU matmuls, M = Bt*H rows -------
        def slab1(kh):
            return x_ref[:, kh:kh + H, :].reshape(Bt * H, Wp * Cin)

        acc1 = jnp.dot(slab1(0), w1_ref[0], preferred_element_type=jnp.float32)
        for kh in range(1, K):
            acc1 += jnp.dot(slab1(kh), w1_ref[kh],
                            preferred_element_type=jnp.float32)
        y1 = jnp.maximum(acc1 + b1_ref[...], 0.0).astype(jnp.bfloat16)

        # Zero the H-halo rows (models conv2's zero padding in H) and write
        # the interior.  Zeroing every step (2*P tiny row stores per image) is
        # cheap and keeps megacore "parallel" sharding correct (each core has
        # its own scratch, so a program_id==0 init would not reach core 1).
        y1s_ref[:, 0:P, :] = jnp.zeros((Bt, P, NL), jnp.bfloat16)
        y1s_ref[:, P + H:, :] = jnp.zeros((Bt, P, NL), jnp.bfloat16)
        y1s_ref[:, P:P + H, :] = y1.reshape(Bt, H, NL)

        # ---- conv2 (+bias, ReLU): windows the zero-haloed activation --------
        def slab2(kh):
            return y1s_ref[:, kh:kh + H, :].reshape(Bt * H, NL)

        acc2 = jnp.dot(slab2(0), w2_ref[0], preferred_element_type=jnp.float32)
        for kh in range(1, K):
            acc2 += jnp.dot(slab2(kh), w2_ref[kh],
                            preferred_element_type=jnp.float32)
        y2 = jnp.maximum(acc2 + b2_ref[...], 0.0)        # (Bt*H, NL) f32

        # ---- max_pool2d(MP), stride MP, floor mode, fully vectorized --------
        # H-pool: sublane regroup within each image; lanes untouched.
        y2b = y2.reshape(Bt, H, NL)[:, :Ho * MP, :].reshape(Bt * Ho, MP, NL)
        yh = jnp.max(y2b, axis=1)                        # (Bt*Ho, NL)
        # W-pool: max over MP lane-rotated copies (runs in the XLU slot).
        # Rotation wraparound only lands on lanes whose wo is not a pooling
        # window start; the wrapper discards those, so kept maxima are exact.
        pooled = yh
        for m in range(1, MP):
            pooled = jnp.maximum(
                pooled, pltpu.roll(yh, shift=(W - m) * Cout, axis=1))
        out_ref[...] = pooled.reshape(Bt, Ho, NL)

        # TODO(synk): nn.Dropout2d is stochastic channel dropout in training
        # mode; eval-mode (identity) semantics are implemented here.

    return kernel


def make_cnn2d_double_maxpool(w1_oihw, b1, w2_oihw, b2, *, h_input, w_input,
                              cnn_kernel_size, maxpool_kernel_size,
                              block_batch=8):
    """Builds banded weights once and returns a jittable forward(x_nchw)."""
    w1_np = np.asarray(w1_oihw, np.float32)
    w2_np = np.asarray(w2_oihw, np.float32)
    Cout, Cin, K, _ = w1_np.shape
    H, W, MP = h_input, w_input, maxpool_kernel_size
    P = (K - 1) // 2
    Hp, Wp = H + 2 * P, W + 2 * P
    Ho, Wo = H // MP, W // MP
    NL = W * Cout

    # ---- banded conv weights / tiled biases (built once, numpy) -------------
    w1_k = w1_np.transpose(2, 3, 1, 0)                   # (kh, kw, Ci, Co)
    w2_k = w2_np.transpose(2, 3, 1, 0)
    w1t = np.stack([_banded_weight_np(w1_k[kh], Wp, W, off=0) for kh in range(K)])
    w2t = np.stack([_banded_weight_np(w2_k[kh], W, W, off=P) for kh in range(K)])
    w1t = jnp.asarray(w1t, jnp.bfloat16)                 # (K, Wp*Cin, NL)
    w2t = jnp.asarray(w2t, jnp.bfloat16)                 # (K, NL, NL)
    b1t = jnp.asarray(np.broadcast_to(np.asarray(b1, np.float32),
                                      (W, Cout)).reshape(1, NL))
    b2t = jnp.asarray(np.broadcast_to(np.asarray(b2, np.float32),
                                      (W, Cout)).reshape(1, NL))

    def forward(x_nchw):
        B = x_nchw.shape[0]
        # Largest per-step batch <= block_batch dividing B while keeping the
        # grid >= 2 steps (dual-TC sharding on v7x).  block_batch=8 targets
        # M = Bt*H = 128 matmul rows; use 16 on v6e/v7x for M = 256.
        bt = 1
        for cand in range(1, min(block_batch, B) + 1):
            if B % cand == 0 and (B // cand >= 2 or B == 1):
                bt = cand
        kernel = _make_kernel(bt, H, W, Cin, Cout, K, MP)

        x = jnp.transpose(x_nchw, (0, 2, 3, 1)).astype(jnp.bfloat16)
        x = jnp.pad(x, ((0, 0), (P, P), (P, P), (0, 0)))
        x = x.reshape(B, Hp, Wp * Cin)

        out_raw = pl.pallas_call(
            kernel,
            out_shape=jax.ShapeDtypeStruct((B, Ho, NL), jnp.float32),
            grid=(B // bt,),
            in_specs=[
                pl.BlockSpec((bt, Hp, Wp * Cin), lambda b: (b, 0, 0)),
                pl.BlockSpec((K, Wp * Cin, NL), lambda b: (0, 0, 0)),
                pl.BlockSpec((1, NL), lambda b: (0, 0)),
                pl.BlockSpec((K, NL, NL), lambda b: (0, 0, 0)),
                pl.BlockSpec((1, NL), lambda b: (0, 0)),
            ],
            out_specs=pl.BlockSpec((bt, Ho, NL), lambda b: (b, 0, 0)),
            scratch_shapes=[pltpu.VMEM((bt, H + 2 * P, NL), jnp.bfloat16)],
            compiler_params=pltpu.CompilerParams(
                dimension_semantics=("parallel",),
                vmem_limit_bytes=4 * 1024 * 1024),
        )(x, w1t, b1t, w2t, b2t)

        # pooled value for output column wo lives at lane (wo*MP)*Cout + co;
        # keep the kernel store 128-lane dense and drop lanes in the wrapper.
        out = out_raw.reshape(B, Ho, W, Cout)[:, :, 0:Wo * MP:MP, :]
        return jnp.transpose(out, (0, 3, 1, 2))          # pooled NHWC -> NCHW

    return forward


def reference_forward(x, w1, b1, w2, b2, K, MP):
    """Pure-JAX f32 reference mirroring the PyTorch forward (eval dropout)."""
    P = (K - 1) // 2
    dn = ('NCHW', 'OIHW', 'NCHW')
    y = lax.conv_general_dilated(x, w1, (1, 1), [(P, P), (P, P)],
                                 dimension_numbers=dn)
    y = jax.nn.relu(y + b1.reshape(1, -1, 1, 1))
    y = lax.conv_general_dilated(y, w2, (1, 1), [(P, P), (P, P)],
                                 dimension_numbers=dn)
    y = jax.nn.relu(y + b2.reshape(1, -1, 1, 1))
    y = lax.reduce_window(y, -jnp.inf, lax.max,
                          (1, 1, MP, MP), (1, 1, MP, MP), 'VALID')
    return y


if __name__ == "__main__":
    # CNN2DDoubleMaxpool(input_channel=4, h_input=16, w_input=16,
    #                    output_channel=8, cnn_kernel_size=3,
    #                    maxpool_kernel_size=2)
    B, Cin, H, W = 2, 4, 16, 16
    Cout, K, MP = 8, 3, 2

    key = jax.random.PRNGKey(0)
    kx, k1, k2, k3, k4 = jax.random.split(key, 5)
    x = jax.random.normal(kx, (B, Cin, H, W), jnp.float32)
    w1 = jax.random.normal(k1, (Cout, Cin, K, K), jnp.float32) * 0.1
    b1 = jax.random.normal(k2, (Cout,), jnp.float32) * 0.1
    w2 = jax.random.normal(k3, (Cout, Cout, K, K), jnp.float32) * 0.1
    b2 = jax.random.normal(k4, (Cout,), jnp.float32) * 0.1

    forward = jax.jit(make_cnn2d_double_maxpool(
        w1, b1, w2, b2, h_input=H, w_input=W,
        cnn_kernel_size=K, maxpool_kernel_size=MP))

    # Primary case: B=2 -> Bt=1 per step, grid=(2,) (keeps dual-TC sharding).
    out = jax.block_until_ready(forward(x))
    ref = reference_forward(x, w1, b1, w2, b2, K, MP)
    assert out.shape == (B, Cout, H // MP, W // MP), out.shape
    # bf16 MXU operands / bf16 inter-conv activations -> relaxed tolerance.
    np.testing.assert_allclose(np.asarray(out), np.asarray(ref),
                               rtol=3e-2, atol=3e-2)

    # Batched case: B=16 -> Bt=8 per step (M = 128 matmul rows), grid=(2,).
    xb = jax.random.normal(kx, (16, Cin, H, W), jnp.float32)
    outb = jax.block_until_ready(forward(xb))
    refb = reference_forward(xb, w1, b1, w2, b2, K, MP)
    np.testing.assert_allclose(np.asarray(outb), np.asarray(refb),
                               rtol=3e-2, atol=3e-2)

    print("KERNEL_OK")
</pallas_src>

<mosaic_0001>
module attributes {stable_mosaic.version = 11 : i64} {
  func.func @kernel(%arg0: i32, %arg1: memref<1x18x72xbf16, #tpu.memory_space<vmem>>, %arg2: memref<3x72x128xbf16, #tpu.memory_space<vmem>>, %arg3: memref<1x128xf32, #tpu.memory_space<vmem>>, %arg4: memref<3x128x128xbf16, #tpu.memory_space<vmem>>, %arg5: memref<1x128xf32, #tpu.memory_space<vmem>>, %arg6: memref<1x8x128xf32, #tpu.memory_space<vmem>>, %arg7: memref<1x18x128xbf16, #tpu.memory_space<vmem>>) attributes {dimension_semantics = [#tpu.dimension_semantics<parallel>], iteration_bounds = array<i64: 2>, scalar_prefetch = 0 : i64, scratch_operands = 1 : i64, tpu.core_type = #tpu.core_type<tc>, window_params = [{transform_indices = @transform_0, window_bounds = array<i64: 1, 18, 72>}, {pipeline_mode = #tpu.pipeline_mode<synchronous>, transform_indices = @transform_1, window_bounds = array<i64: 3, 72, 128>}, {pipeline_mode = #tpu.pipeline_mode<synchronous>, transform_indices = @transform_2, window_bounds = array<i64: 1, 128>}, {pipeline_mode = #tpu.pipeline_mode<synchronous>, transform_indices = @transform_3, window_bounds = array<i64: 3, 128, 128>}, {pipeline_mode = #tpu.pipeline_mode<synchronous>, transform_indices = @transform_4, window_bounds = array<i64: 1, 128>}, {transform_indices = @transform_5, window_bounds = array<i64: 1, 8, 128>}]} {
    %c0 = arith.constant 0 : index
    %c0_0 = arith.constant 0 : index
    %c0_1 = arith.constant 0 : index
    %0 = vector.load %arg1[%c0, %c0_0, %c0_1] : memref<1x18x72xbf16, #tpu.memory_space<vmem>>, vector<1x16x72xbf16>
    %1 = vector.shape_cast %0 : vector<1x16x72xbf16> to vector<16x72xbf16>
    %c0_2 = arith.constant 0 : index
    %c0_3 = arith.constant 0 : index
    %c0_4 = arith.constant 0 : index
    %2 = vector.load %arg2[%c0_2, %c0_3, %c0_4] : memref<3x72x128xbf16, #tpu.memory_space<vmem>>, vector<1x72x128xbf16>
    %3 = vector.shape_cast %2 : vector<1x72x128xbf16> to vector<72x128xbf16>
    %cst = arith.constant dense<0.000000e+00> : vector<16x128xf32>
    %4 = tpu.matmul %1, %3, %cst {dimension_numbers = #tpu.dot_dimension_numbers<[1], [0], [0], [1], [0, 0, 1, 1], [], []>} : vector<16x72xbf16>, vector<72x128xbf16>, vector<16x128xf32> -> vector<16x128xf32>
    %c0_5 = arith.constant 0 : index
    %c1 = arith.constant 1 : index
    %c0_6 = arith.constant 0 : index
    %5 = vector.load %arg1[%c0_5, %c1, %c0_6] : memref<1x18x72xbf16, #tpu.memory_space<vmem>>, vector<1x16x72xbf16>
    %6 = vector.shape_cast %5 : vector<1x16x72xbf16> to vector<16x72xbf16>
    %c1_7 = arith.constant 1 : index
    %c0_8 = arith.constant 0 : index
    %c0_9 = arith.constant 0 : index
    %7 = vector.load %arg2[%c1_7, %c0_8, %c0_9] : memref<3x72x128xbf16, #tpu.memory_space<vmem>>, vector<1x72x128xbf16>
    %8 = vector.shape_cast %7 : vector<1x72x128xbf16> to vector<72x128xbf16>
    %cst_10 = arith.constant dense<0.000000e+00> : vector<16x128xf32>
    %9 = tpu.matmul %6, %8, %cst_10 {dimension_numbers = #tpu.dot_dimension_numbers<[1], [0], [0], [1], [0, 0, 1, 1], [], []>} : vector<16x72xbf16>, vector<72x128xbf16>, vector<16x128xf32> -> vector<16x128xf32>
    %10 = arith.addf %4, %9 : vector<16x128xf32>
    %c0_11 = arith.constant 0 : index
    %c2 = arith.constant 2 : index
    %c0_12 = arith.constant 0 : index
    %11 = vector.load %arg1[%c0_11, %c2, %c0_12] : memref<1x18x72xbf16, #tpu.memory_space<vmem>>, vector<1x16x72xbf16>
    %12 = vector.shape_cast %11 : vector<1x16x72xbf16> to vector<16x72xbf16>
    %c2_13 = arith.constant 2 : index
    %c0_14 = arith.constant 0 : index
    %c0_15 = arith.constant 0 : index
    %13 = vector.load %arg2[%c2_13, %c0_14, %c0_15] : memref<3x72x128xbf16, #tpu.memory_space<vmem>>, vector<1x72x128xbf16>
    %14 = vector.shape_cast %13 : vector<1x72x128xbf16> to vector<72x128xbf16>
    %cst_16 = arith.constant dense<0.000000e+00> : vector<16x128xf32>
    %15 = tpu.matmul %12, %14, %cst_16 {dimension_numbers = #tpu.dot_dimension_numbers<[1], [0], [0], [1], [0, 0, 1, 1], [], []>} : vector<16x72xbf16>, vector<72x128xbf16>, vector<16x128xf32> -> vector<16x128xf32>
    %16 = arith.addf %10, %15 : vector<16x128xf32>
    %c0_17 = arith.constant 0 : index
    %c0_18 = arith.constant 0 : index
    %17 = vector.load %arg3[%c0_17, %c0_18] : memref<1x128xf32, #tpu.memory_space<vmem>>, vector<1x128xf32>
    %18 = vector.broadcast %17 : vector<1x128xf32> to vector<16x128xf32>
    %19 = arith.addf %16, %18 : vector<16x128xf32>
    %cst_19 = arith.constant 0.000000e+00 : f32
    %20 = vector.broadcast %cst_19 : f32 to vector<16x128xf32>
    %21 = arith.maximumf %19, %20 : vector<16x128xf32>
    %22 = arith.truncf %21 : vector<16x128xf32> to vector<16x128xbf16>
    %cst_20 = arith.constant 0.000000e+00 : bf16
    %23 = vector.broadcast %cst_20 : bf16 to vector<1x1x128xbf16>
    %c0_21 = arith.constant 0 : index
    %c0_22 = arith.constant 0 : index
    %c0_23 = arith.constant 0 : index
    %24 = vector.load %arg7[%c0_21, %c0_22, %c0_23] : memref<1x18x128xbf16, #tpu.memory_space<vmem>>, vector<1x1x128xbf16>
    tpu.vector_store %arg7[%c0_21, %c0_22, %c0_23], %23 {strides = array<i32>} : memref<1x18x128xbf16, #tpu.memory_space<vmem>>, vector<1x1x128xbf16>,
    %cst_24 = arith.constant 0.000000e+00 : bf16
    %25 = vector.broadcast %cst_24 : bf16 to vector<1x1x128xbf16>
    %c0_25 = arith.constant 0 : index
    %c17 = arith.constant 17 : index
    %c0_26 = arith.constant 0 : index
    %26 = vector.load %arg7[%c0_25, %c17, %c0_26] : memref<1x18x128xbf16, #tpu.memory_space<vmem>>, vector<1x1x128xbf16>
    tpu.vector_store %arg7[%c0_25, %c17, %c0_26], %25 {strides = array<i32>} : memref<1x18x128xbf16, #tpu.memory_space<vmem>>, vector<1x1x128xbf16>,
    %27 = vector.shape_cast %22 : vector<16x128xbf16> to vector<1x16x128xbf16>
    %c0_27 = arith.constant 0 : index
    %c1_28 = arith.constant 1 : index
    %c0_29 = arith.constant 0 : index
    %28 = vector.load %arg7[%c0_27, %c1_28, %c0_29] : memref<1x18x128xbf16, #tpu.memory_space<vmem>>, vector<1x16x128xbf16>
    tpu.vector_store %arg7[%c0_27, %c1_28, %c0_29], %27 {strides = array<i32>} : memref<1x18x128xbf16, #tpu.memory_space<vmem>>, vector<1x16x128xbf16>,
    %c0_30 = arith.constant 0 : index
    %c0_31 = arith.constant 0 : index
    %c0_32 = arith.constant 0 : index
    %29 = vector.load %arg7[%c0_30, %c0_31, %c0_32] : memref<1x18x128xbf16, #tpu.memory_space<vmem>>, vector<1x16x128xbf16>
    %30 = vector.shape_cast %29 : vector<1x16x128xbf16> to vector<16x128xbf16>
    %c0_33 = arith.constant 0 : index
    %c0_34 = arith.constant 0 : index
    %c0_35 = arith.constant 0 : index
    %31 = vector.load %arg4[%c0_33, %c0_34, %c0_35] : memref<3x128x128xbf16, #tpu.memory_space<vmem>>, vector<1x128x128xbf16>
    %32 = vector.shape_cast %31 : vector<1x128x128xbf16> to vector<128x128xbf16>
    %cst_36 = arith.constant dense<0.000000e+00> : vector<16x128xf32>
    %33 = tpu.matmul %30, %32, %cst_36 {dimension_numbers = #tpu.dot_dimension_numbers<[1], [0], [0], [1], [0, 0, 1, 1], [], []>} : vector<16x128xbf16>, vector<128x128xbf16>, vector<16x128xf32> -> vector<16x128xf32>
    %c0_37 = arith.constant 0 : index
    %c1_38 = arith.constant 1 : index
    %c0_39 = arith.constant 0 : index
    %34 = vector.load %arg7[%c0_37, %c1_38, %c0_39] : memref<1x18x128xbf16, #tpu.memory_space<vmem>>, vector<1x16x128xbf16>
    %35 = vector.shape_cast %34 : vector<1x16x128xbf16> to vector<16x128xbf16>
    %c1_40 = arith.constant 1 : index
    %c0_41 = arith.constant 0 : index
    %c0_42 = arith.constant 0 : index
    %36 = vector.load %arg4[%c1_40, %c0_41, %c0_42] : memref<3x128x128xbf16, #tpu.memory_space<vmem>>, vector<1x128x128xbf16>
    %37 = vector.shape_cast %36 : vector<1x128x128xbf16> to vector<128x128xbf16>
    %cst_43 = arith.constant dense<0.000000e+00> : vector<16x128xf32>
    %38 = tpu.matmul %35, %37, %cst_43 {dimension_numbers = #tpu.dot_dimension_numbers<[1], [0], [0], [1], [0, 0, 1, 1], [], []>} : vector<16x128xbf16>, vector<128x128xbf16>, vector<16x128xf32> -> vector<16x128xf32>
    %39 = arith.addf %33, %38 : vector<16x128xf32>
    %c0_44 = arith.constant 0 : index
    %c2_45 = arith.constant 2 : index
    %c0_46 = arith.constant 0 : index
    %40 = vector.load %arg7[%c0_44, %c2_45, %c0_46] : memref<1x18x128xbf16, #tpu.memory_space<vmem>>, vector<1x16x128xbf16>
    %41 = vector.shape_cast %40 : vector<1x16x128xbf16> to vector<16x128xbf16>
    %c2_47 = arith.constant 2 : index
    %c0_48 = arith.constant 0 : index
    %c0_49 = arith.constant 0 : index
    %42 = vector.load %arg4[%c2_47, %c0_48, %c0_49] : memref<3x128x128xbf16, #tpu.memory_space<vmem>>, vector<1x128x128xbf16>
    %43 = vector.shape_cast %42 : vector<1x128x128xbf16> to vector<128x128xbf16>
    %cst_50 = arith.constant dense<0.000000e+00> : vector<16x128xf32>
    %44 = tpu.matmul %41, %43, %cst_50 {dimension_numbers = #tpu.dot_dimension_numbers<[1], [0], [0], [1], [0, 0, 1, 1], [], []>} : vector<16x128xbf16>, vector<128x128xbf16>, vector<16x128xf32> -> vector<16x128xf32>
    %45 = arith.addf %39, %44 : vector<16x128xf32>
    %c0_51 = arith.constant 0 : index
    %c0_52 = arith.constant 0 : index
    %46 = vector.load %arg5[%c0_51, %c0_52] : memref<1x128xf32, #tpu.memory_space<vmem>>, vector<1x128xf32>
    %47 = vector.broadcast %46 : vector<1x128xf32> to vector<16x128xf32>
    %48 = arith.addf %45, %47 : vector<16x128xf32>
    %cst_53 = arith.constant 0.000000e+00 : f32
    %49 = vector.broadcast %cst_53 : f32 to vector<16x128xf32>
    %50 = arith.maximumf %48, %49 : vector<16x128xf32>
    %51 = vector.shape_cast %50 : vector<16x128xf32> to vector<1x16x128xf32>
    %52 = vector.shape_cast %51 : vector<1x16x128xf32> to vector<8x2x128xf32>
    %cst_54 = arith.constant dense<0xFF800000> : vector<8x128xf32>
    %53 = vector.multi_reduction <maximumf>, %52, %cst_54 [1] : vector<8x2x128xf32> to vector<8x128xf32>
    %c120_i32 = arith.constant 120 : i32
    %54 = tpu.dynamic_rotate %53 by %c120_i32 dim 1 : vector<8x128xf32>, i32 -> vector<8x128xf32>
    %55 = arith.maximumf %53, %54 : vector<8x128xf32>
    %56 = vector.shape_cast %55 : vector<8x128xf32> to vector<1x8x128xf32>
    %c0_55 = arith.constant 0 : index
    %c0_56 = arith.constant 0 : index
    %c0_57 = arith.constant 0 : index
    %57 = vector.load %arg6[%c0_55, %c0_56, %c0_57] : memref<1x8x128xf32, #tpu.memory_space<vmem>>, vector<1x8x128xf32>
    tpu.vector_store %arg6[%c0_55, %c0_56, %c0_57], %56 {strides = array<i32>} : memref<1x8x128xf32, #tpu.memory_space<vmem>>, vector<1x8x128xf32>,
    return
  }
  func.func @transform_0(%arg0: i32) -> (i32, i32, i32) {
    %c0_i32 = arith.constant 0 : i32
    %c0_i32_0 = arith.constant 0 : i32
    %c0_i32_1 = arith.constant 0 : i32
    return %arg0, %c0_i32, %c0_i32_0 : i32, i32, i32
  }
  func.func @transform_1(%arg0: i32) -> (i32, i32, i32) {
    %c0_i32 = arith.constant 0 : i32
    %c0_i32_0 = arith.constant 0 : i32
    %c0_i32_1 = arith.constant 0 : i32
    %c0_i32_2 = arith.constant 0 : i32
    return %c0_i32, %c0_i32_0, %c0_i32_1 : i32, i32, i32
  }
  func.func @transform_2(%arg0: i32) -> (i32, i32) {
    %c0_i32 = arith.constant 0 : i32
    %c0_i32_0 = arith.constant 0 : i32
    %c0_i32_1 = arith.constant 0 : i32
    return %c0_i32, %c0_i32_0 : i32, i32
  }
  func.func @transform_3(%arg0: i32) -> (i32, i32, i32) {
    %c0_i32 = arith.constant 0 : i32
    %c0_i32_0 = arith.constant 0 : i32
    %c0_i32_1 = arith.constant 0 : i32
    %c0_i32_2 = arith.constant 0 : i32
    return %c0_i32, %c0_i32_0, %c0_i32_1 : i32, i32, i32
  }
  func.func @transform_4(%arg0: i32) -> (i32, i32) {
    %c0_i32 = arith.constant 0 : i32
    %c0_i32_0 = arith.constant 0 : i32
    %c0_i32_1 = arith.constant 0 : i32
    return %c0_i32, %c0_i32_0 : i32, i32
  }
  func.func @transform_5(%arg0: i32) -> (i32, i32, i32) {
    %c0_i32 = arith.constant 0 : i32
    %c0_i32_0 = arith.constant 0 : i32
    %c0_i32_1 = arith.constant 0 : i32
    return %arg0, %c0_i32, %c0_i32_0 : i32, i32, i32
  }
}

</mosaic_0001>

<bundles_post_ra>
// kernel: forward.1
= control target key start
LH: loop header
LB: loop body
LE: loop exit
PB: predicated region body
PF: predicated region fallthrough
CT: control target
= control target key end

     0   :  { %s1519_s18 = smov 0   ;;  %s1771_s0 = inlined_call_operand.vmem [shape: bf16[2,18,72], index: 0, kind: input, shape index: {}]   ;;  %s1772_s1 = inlined_call_operand.vmem [shape: bf16[3,72,128], index: 1, kind: input, shape index: {}]   ;;  %s1773_s2 = inlined_call_operand.vmem [shape: f32[1,128], index: 2, kind: input, shape index: {}]   ;;  %s1774_s3 = inlined_call_operand.vmem [shape: bf16[3,128,128], index: 3, kind: input, shape index: {}]   ;;  %s1775_s4 = inlined_call_operand.vmem [shape: f32[1,128], index: 4, kind: input, shape index: {}]   ;;  %s1776_s5 = inlined_call_operand.vmem [shape: f32[2,8,128], index: 5, kind: output, shape index: {}]  }
   0x1 LB: > { %s1159_s19 = sadd.s32 4294967295, %s1483_s18   ;;  %p1163_p0 = scmp.ge.s32.totalorder %s1483_s18, 1  ;;  %s1483_s18 = sphi %s1519_s18, %s15_s18  }
   0x2   : > { %p187_p1 = scmp.lt.s32.totalorder %s1483_s18, 3 }
   0x4   : > { %p188_p2 = pnand %p1163_p0, %p187_p1 }
   0x5   : > { %v1432_v0 = vld [vmem:[%s1772_s1 + $0x24] sm:$0xff] (!%p188_p2)   ;;  %v1485_v1 = vmov (!%p188_p2), 0.0   ;;  %v1434_v3 = vld [vmem:[%s1772_s1 + $0x2c] sm:$0xff] (!%p188_p2)   ;;  %vm1486_vm0 = vmmov (!%p188_p2), 0   ;;  %p214_p3 = scmp.lt.s32.totalorder (!%p188_p2), %s1159_s19, 1  ;;  %v1436_v5 = vld [vmem:[%s1772_s1 + $0x34] sm:$0xff] (!%p188_p2)  }
   0x6   : > { %191 = sbr.rel (%p188_p2) target bundleno = 697 (0x2b9), region = 40  ;;  %1317 = vmatprep.subr.bf16.mxu0 (!%p188_p2), %v1485_v1  ;;  %1331 = vmatprep.subr.bf16.mxu1 (!%p188_p2), %v1485_v1  ;;  %v1433_v2 = vld [vmem:[%s1772_s1] sm:$0xff] (!%p188_p2)   ;;  %v1435_v4 = vld [vmem:[%s1772_s1 + $0x8] sm:$0xff] (!%p188_p2)   ;;  %vm522_vm1 = vcmask (!%p188_p2), 1040384   ;;  %v1437_v6 = vld [vmem:[%s1772_s1 + $0x10] sm:$0xff] (!%p188_p2)   ;;  %vm298_vm5 = vcmask (!%p188_p2), 1043456  }
   0x7   : > { %1318 = vmatpush3.bf16.msra.mxu0 (!%p188_p2), %v1432_v0  ;;  %1332 = vmatpush3.bf16.msra.mxu1 (!%p188_p2), %v1433_v2  ;;  %vm523_vm2 = vsmask.f32 (!%p188_p2), 256  ;;  %v525_v8 = vld [vmem:[#allocation2] sm:$0x1] (!%p188_p2)  ;;  %vm528_vm4 = vsmask.f32 (!%p188_p2), 7938 }
   0x8   : > { %1319 = vmatprep.subr.bf16.mxu0 (!%p188_p2), %v1485_v1  ;;  %1333 = vmatprep.subr.bf16.mxu1 (!%p188_p2), %v1485_v1  ;;  %vm1559_vm3 = vmand (!%p188_p2), %vm522_vm1, %vm523_vm2  ;;  %v530_v9 = vld [vmem:[#allocation2 + $0x8] sm:$0x1] (!%p188_p2)  ;;  %v1438_v10 = vld [vmem:[%s1772_s1 + $0x3c] sm:$0xff] (!%p188_p2)   ;;  %vm294_vm8 = vcmask (!%p188_p2), 588800   ;;  %vm254_vm9 = vsmask.f32 (!%p188_p2), 7424 }
   0x9   : > { %1327 = vmatprep.mubr.msk.bf16.mxu0 (!%p188_p2), %vm1486_vm0, %v1485_v1  ;;  %1341 = vmatprep.mubr.msk.bf16.mxu1 (!%p188_p2), %vm1486_vm0, %v1485_v1  ;;  %v526_v11 = vsel (!%p188_p2), %vm1559_vm3, 0, %v525_v8  ;;  %vm529_vm6 = vmand (!%p188_p2), %vm522_vm1, %vm528_vm4  ;;  %v1439_v12 = vld [vmem:[%s1772_s1 + $0x18] sm:$0xff] (!%p188_p2)   ;;  %v1440_v13 = vld [vmem:[%s1772_s1 + $0x44] ss:$0 sps:$4 sm:$0xff] (!%p188_p2)   ;;  %vm430_vm10 = vcmask (!%p188_p2), 1046528   ;;  %vm976_vm13 = vcmask (!%p188_p2), 1041408  }
   0xa   : > { %527 = vst [vmem:[#allocation2] sm:$0x1] (!%p188_p2), %v526_v11  ;;  %v531_v14 = vsel (!%p188_p2), %vm529_vm6, 0, %v530_v9  ;;  %vm1577_vm7 = vmand (!%p188_p2), %vm298_vm5, %vm528_vm4  ;;  %v1441_v16 = vld [vmem:[%s1772_s1 + $0x20] ss:$0 sps:$4 sm:$0xff] (!%p188_p2)   ;;  %v300_v19 = vsel (!%p188_p2), %vm298_vm5, %v1440_v13, 0 }
   0xb   : > { %1320 = vmatpush3.bf16.msra.mxu0 (!%p188_p2), %v1434_v3  ;;  %1334 = vmatpush3.bf16.msra.mxu1 (!%p188_p2), %v1435_v4  ;;  %532 = vst [vmem:[#allocation2 + $0x8] sm:$0x1] (!%p188_p2), %v531_v14  ;;  %v373_v22 = vsel (!%p188_p2), %vm298_vm5, %v1441_v16, 0  ;;  %v1444_v29 = vld [vmem:[%s1772_s1 + $0x48] sm:$0xff] (!%p188_p2)   ;;  %v1445_v31 = vld [vmem:[%s1772_s1 + $0x50] sm:$0xff] (!%p188_p2)   ;;  %v1446_v32 = vld [vmem:[%s1772_s1 + $0x58] sm:$0xff] (!%p188_p2)  }
   0xc   : > { %1321 = vmatprep.subr.bf16.mxu0 (!%p188_p2), %v1485_v1  ;;  %1335 = vmatprep.subr.bf16.mxu1 (!%p188_p2), %v1485_v1  ;;  %v1447_v34 = vld [vmem:[%s1772_s1 + $0x60] sm:$0xff] (!%p188_p2)   ;;  %v1448_v35 = vld [vmem:[%s1772_s1 + $0x68] ss:$0 sps:$4 sm:$0xff] (!%p188_p2)   ;;  %v1453_v44 = vld [vmem:[%s1774_s3 + $0x10] sm:$0xff] (!%p188_p2)   ;;  %vm538_vm11 = vsmask.f32 (!%p188_p2), 4368 }
   0xd   : > { %s1782_s19 = smov (!%p214_p3, %s1159_s19), 1  ;;  %v465_v39 = vsel %vm298_vm5, %v1448_v35, 0  ;;  %v1450_v41 = vld [vmem:[%s1774_s3] sm:$0xff]   ;;  %v1451_v42 = vld [vmem:[%s1774_s3 + $0x8] sm:$0xff]   ;;  %v1455_v46 = vld [vmem:[%s1774_s3 + $0x18] sm:$0xff]   ;;  %vm1041_vm14 = vcmask 1041409  }
   0xe   : > { %s1419_s13 = smul.u32 12, %s1782_s19  ;;  %v1452_v43 = vld [vmem:[%s1774_s3 + $0x40] sm:$0xff]   ;;  %v1454_v45 = vld [vmem:[%s1774_s3 + $0x48] sm:$0xff]   ;;  %v1456_v47 = vld [vmem:[%s1774_s3 + $0x50] sm:$0xff]   ;;  %vm1043_vm15 = vcmask 1042434   ;;  %vm1047_vm1 = vcmask 1044484  }
   0xf   : > { %1322 = vmatpush3.bf16.msra.mxu0 %v1436_v5  ;;  %1336 = vmatpush3.bf16.msra.mxu1 %v1437_v6  ;;  %v1457_v48 = vld [vmem:[%s1774_s3 + $0x20] sm:$0xff]   ;;  %v1458_v49 = vld [vmem:[%s1774_s3 + $0x58] sm:$0xff]   ;;  %v1459_v50 = vld [vmem:[%s1774_s3 + $0x28] sm:$0xff]   ;;  %vm1053_vm4 = vcmask 1047559   ;;  %s1488_s12 = smov 120  }
  0x10   : > { %1323 = vmatprep.subr.bf16.mxu0 %v1485_v1  ;;  %1337 = vmatprep.subr.bf16.mxu1 %v1485_v1  ;;  %s1589_s20 = scalar_lea.vmem %s1771_s0, %s1419_s13  ;;  %v1460_v51 = vld [vmem:[%s1774_s3 + $0x60] sm:$0xff]   ;;  %v1461_v52 = vld [vmem:[%s1774_s3 + $0x30] sm:$0xff]   ;;  %v1462_v53 = vld [vmem:[%s1774_s3 + $0x68] sm:$0xff]   ;;  %s1165_s13 = sshll.u32 %s1782_s19, 3 }
  0x11   : > { %v224_v17 = vld [vmem:[%s1589_s20] sm:$0xf]  ;;  %v225_v18 = vld [vmem:[%s1589_s20 + $0x4] sm:$0xf]  ;;  %v1463_v54 = vld [vmem:[%s1774_s3 + $0x38] sm:$0xff]   ;;  %s222_s16 = scalar_lea.vmem %s1776_s5, %s1165_s13 }
  0x12   : > { %v1175_v20 = vcombine.low %v224_v17, %v225_v18  ;;  %v1443_v21 = vld [vmem:[%s1589_s20 + $0x8] ss:$0 sps:$4 sm:$0x11]   ;;  %v416_v33 = vld [vmem:[%s1589_s20] sm:$0xe]  ;;  %v1464_v55 = vld [vmem:[%s1774_s3 + $0x70] sm:$0xff]  }
  0x13   : > { %1324 = vmatpush3.bf16.msra.mxu0 %v1438_v10  ;;  %1338 = vmatpush3.bf16.msra.mxu1 %v1439_v12  ;;  %v263_v25 = vshll.u32 %v1443_v21, 16  ;;  %v1198_v36 = vcombine.low %v416_v33, %v225_v18  ;;  %v432_v38 = vrot.slane %v1443_v21, 1  ;;  %v1466_v56 = vld [vmem:[%s1774_s3 + $0x78] sm:$0xff]   ;;  %v1205_v5 = vld [vmem:[%s1773_s2] ss:$0 sm:$0xff]  ;;  %vm539_vm12 = vmor %vm523_vm2, %vm538_vm11  ;;  %vm1049_vm2 = vcmask 1045509  }
  0x14   : > { %1325 = vmatprep.subr.bf16.mxu0 %v1485_v1  ;;  %1339 = vmatprep.subr.bf16.mxu1 %v1485_v1  ;;  %v256_v23 = vshrl.u32 %v1175_v20, 16  ;;  %v258_v24 = vshll.u32 %v1175_v20, 16 }
  0x15   : > { %v265_v27 = vrot.slane %v263_v25, 1  ;;  %v431_v37 = vrot.slane %v1198_v36, 1 }
  0x16   : > { %v260_v26 = vrot.slane %v258_v24, 1 }
  0x17   : > { %1326 = vmatpush3.bf16.msra.mxu0 %v300_v19  ;;  %1340 = vmatpush3.bf16.msra.mxu1 %v373_v22  ;;  %v433_v40 = vsel %vm430_vm10, %v431_v37, %v432_v38 }
  0x18   : > { %1345 = vmatprep.subr.bf16.mxu0 %v1485_v1  ;;  %1359 = vmatprep.subr.bf16.mxu1 %v1485_v1  ;;  %v261_v28 = vor.u32 %v260_v26, %v256_v23  ;;  %v562_v23 = vld [vmem:[#allocation2] sm:$0xf] }
  0x1a   : > { %1342 = vmatmul.mubr.msk.bf16.vlgmr.msra.gmra.mrb[0].mxu1 %vm294_vm8, %v1175_v20  ;;  %v266_v30 = vsel %vm254_vm9, %v261_v28, %v265_v27  ;;  %v566_v27 = vld [vmem:[#allocation2 + $0x8] sm:$0x1] }
  0x1b   : > { %1375 = vmatprep.mubr.msk.bf16.mxu1 %vm1486_vm0, %v1485_v1  ;;  %1328 = vmatmul.mubr.msk.bf16.vlgmr.msra.gmra.mrb[0].mxu0 %vm294_vm8, %v266_v30 }
  0x1c   : > { %1346 = vmatpush3.bf16.msra.mxu0 %v1444_v29  ;;  %1355 = vmatprep.mubr.msk.bf16.mxu0 %vm1486_vm0, %v1485_v1 }
  0x1d   : > { %1347 = vmatprep.subr.bf16.mxu0 %v1485_v1  ;;  %1360 = vmatpush3.bf16.msra.mxu1 %v1452_v43  ;;  %v1468_v43 = vld [vmem:[%s1774_s3 + $0x80] sm:$0xff]  }
  0x1e   : > { %1361 = vmatprep.subr.bf16.mxu1 %v1485_v1 }
  0x20   : > { %1348 = vmatpush3.bf16.msra.mxu0 %v1445_v31 }
  0x21   : > { %1349 = vmatprep.subr.bf16.mxu0 %v1485_v1  ;;  %1362 = vmatpush3.bf16.msra.mxu1 %v1454_v45  ;;  %v1470_v45 = vld [vmem:[%s1774_s3 + $0x90] sm:$0xff]  }
  0x22   : > { %1363 = vmatprep.subr.bf16.mxu1 %v1485_v1 }
  0x24   : > { %1350 = vmatpush3.bf16.msra.mxu0 %v1446_v32 }
  0x25   : > { %1351 = vmatprep.subr.bf16.mxu0 %v1485_v1  ;;  %1364 = vmatpush3.bf16.msra.mxu1 %v1456_v47  ;;  %v1472_v47 = vld [vmem:[%s1774_s3 + $0xa0] sm:$0xff]  }
  0x26   : > { %1365 = vmatprep.subr.bf16.mxu1 %v1485_v1 }
  0x28   : > { %1352 = vmatpush3.bf16.msra.mxu0 %v1447_v34 }
  0x29   : > { %1353 = vmatprep.subr.bf16.mxu0 %v1485_v1  ;;  %1366 = vmatpush3.bf16.msra.mxu1 %v1458_v49  ;;  %v1474_v49 = vld [vmem:[%s1774_s3 + $0xb0] sm:$0xff]  }
  0x2a   : > { %1367 = vmatprep.subr.bf16.mxu1 %v1485_v1 }
  0x2c   : > { %1354 = vmatpush3.bf16.msra.mxu0 %v465_v39 }
  0x2d   : > { %1379 = vmatprep.subr.bf16.mxu0 %v1485_v1  ;;  %1368 = vmatpush3.bf16.msra.mxu1 %v1460_v51 }
  0x2e   : > { %1369 = vmatprep.subr.bf16.mxu1 %v1485_v1 }
  0x2f   : > { %1356 = vmatmul.mubr.msk.bf16.vlgmr.msra.gmra.mrb[4].mxu0 %vm294_vm8, %v433_v40 }
  0x30   : > { %1395 = vmatprep.mubr.msk.bf16.mxu0 %vm1486_vm0, %v1485_v1  ;;  %1380 = vmatpush3.bf16.msra.mxu0 %v1450_v41 }
  0x31   : > { %1381 = vmatprep.subr.bf16.mxu0 %v1485_v1  ;;  %1370 = vmatpush3.bf16.msra.mxu1 %v1462_v53 }
  0x32   : > { %1371 = vmatprep.subr.bf16.mxu1 %v1485_v1 }
  0x34   : > { %1382 = vmatpush3.bf16.msra.mxu0 %v1451_v42 }
  0x35   : > { %1383 = vmatprep.subr.bf16.mxu0 %v1485_v1  ;;  %1372 = vmatpush3.bf16.msra.mxu1 %v1464_v55 }
  0x36   : > { %1373 = vmatprep.subr.bf16.mxu1 %v1485_v1 }
  0x38   : > { %1384 = vmatpush3.bf16.msra.mxu0 %v1453_v44  ;;  %v1469_v44 = vld [vmem:[%s1774_s3 + $0x88] sm:$0xff]  }
  0x39   : > { %1385 = vmatprep.subr.bf16.mxu0 %v1485_v1  ;;  %1374 = vmatpush3.bf16.msra.mxu1 %v1466_v56 }
  0x3a   : > { %1399 = vmatprep.subr.bf16.mxu1 %v1485_v1 }
  0x3c   : > { %1386 = vmatpush3.bf16.msra.mxu0 %v1455_v46  ;;  %v1471_v46 = vld [vmem:[%s1774_s3 + $0x98] sm:$0xff]  }
  0x3d   : > { %1387 = vmatprep.subr.bf16.mxu0 %v1485_v1 }
  0x40   : > { %1388 = vmatpush3.bf16.msra.mxu0 %v1457_v48  ;;  %v1473_v48 = vld [vmem:[%s1774_s3 + $0xa8] sm:$0xff]  }
  0x41   : > { %1389 = vmatprep.subr.bf16.mxu0 %v1485_v1 }
  0x44   : > { %1390 = vmatpush3.bf16.msra.mxu0 %v1459_v50 }
  0x45   : > { %1391 = vmatprep.subr.bf16.mxu0 %v1485_v1 }
  0x48   : > { %1392 = vmatpush3.bf16.msra.mxu0 %v1461_v52  ;;  %v1475_v52 = vld [vmem:[%s1774_s3 + $0xb8] sm:$0xff]  }
  0x49   : > { %1393 = vmatprep.subr.bf16.mxu0 %v1485_v1 }
  0x4c   : > { %1394 = vmatpush3.bf16.msra.mxu0 %v1463_v54 }
  0xed   : > { %v409_v57 = vpop.f32.mrb[0].mxu1 }
  0xee   : > { %v1343_v58 = vpop.f32.mrb[1].mxu1  ;;  %v336_v59 = vpop.f32.mrb[0].mxu0 }
  0xef   : > { %v412_v60 = vpop.f32.mrb[2].mxu1  ;;  %v410_v61 = vadd.f32 %v409_v57, %v336_v59  ;;  %v1329_v62 = vpop.f32.mrb[1].mxu0 }
  0xf0   : > { %v1344_v63 = vpop.f32.mrb[3].mxu1  ;;  %v339_v0 = vpop.f32.mrb[2].mxu0 }
  0xf1   : > { %v413_v2 = vadd.f32 %v412_v60, %v339_v0  ;;  %v1330_v3 = vpop.f32.mrb[3].mxu0 }
  0xf2   : > { %v1487_v3 = vmov 1983009808  }
 0x102   : > { %v501_v4 = vpop.f32.mrb[4].mxu0 }
 0x103   : > { %v508_v6 = vadd.f32 %v501_v4, %v410_v61  ;;  %v1357_v8 = vpop.f32.mrb[5].mxu0  ;;  %v936_v4 = vunpack.c.l.s4 %v1487_v3 }
 0x104   : > { %v504_v9 = vpop.f32.mrb[6].mxu0 }
 0x105   : > { %v517_v10 = vadd.f32 %v1205_v5, %v508_v6  ;;  %v509_v11 = vadd.f32 %v504_v9, %v413_v2  ;;  %v1358_v12 = vpop.f32.mrb[7].mxu0  ;;  %v1267_v9 = vld [vmem:[%s1775_s4] ss:$0 sm:$0xff] }
 0x107   : > { %v519_v13 = vmax.f32 %v517_v10, 0.0  ;;  %v518_v14 = vadd.f32 %v1205_v5, %v509_v11  ;;  %v938_v5 = vlaneseq }
 0x109   : > { %v1270_v16 = vpack.c.bf16 %v519_v13, %v519_v13  ;;  %v520_v17 = vmax.f32 %v518_v14, 0.0  ;;  %v939_v6 = vshrl.u32 %v938_v5, 7 }
 0x10b   : > { %v541_v18 = vshrl.u32 %v1270_v16, 16  ;;  %v1271_v19 = vpack.c.bf16 %v520_v17, %v520_v17  ;;  %v544_v21 = vshll.u32 %v1270_v16, 16 }
 0x10d   : > { %v543_v20 = vrot.slane %v541_v18, 7  ;;  %v549_v22 = vshrl.u32 %v1271_v19, 16  ;;  %v552_v26 = vshll.u32 %v1271_v19, 16 }
 0x10f   : > { %v546_v24 = vor.u32 %v544_v21, %v543_v20  ;;  %v551_v25 = vrot.slane %v549_v22, 7  ;;  %v547_v28 = vrot.slane %v543_v20, 4 }
 0x111   : > { %v563_v29 = vsel %vm1577_vm7, %v546_v24, %v562_v23  ;;  %v554_v30 = vor.u32 %v552_v26, %v551_v25  ;;  %v556_v31 = vrot.slane %v551_v25, 4 }
 0x112   : > { %564 = vst [vmem:[#allocation2] sm:$0xf] %v563_v29 }
 0x113   : > { %v555_v32 = vsel %vm539_vm12, %v547_v28, %v554_v30  ;;  %v567_v33 = vsel %vm1559_vm3, %v556_v31, %v566_v27  ;;  %vm1051_vm3 = vcmask 1046534  }
 0x114   : > { %565 = vst [vmem:[#allocation2 + $0x4] sm:$0xf] %v555_v32  ;;  %568 = vst [vmem:[#allocation2 + $0x8] sm:$0x1] %v567_v33 }
 0x119   : > { %v569_v34 = vld [vmem:[#allocation2] sm:$0xf] }
 0x11a   : > { %v805_v50 = vld [vmem:[#allocation2] sm:$0xe] }
 0x11b   : > { %v570_v35 = vld [vmem:[#allocation2 + $0x4] sm:$0xf]  ;;  %v1467_v37 = vld [vmem:[#allocation2 + $0x8] ss:$0 sps:$4 sm:$0x11]  }
 0x11c   : > { %v1224_v36 = vcombine.low %v569_v34, %v570_v35  ;;  %v621_v39 = vshll.u32 %v1467_v37, 16  ;;  %v1258_v51 = vcombine.low %v805_v50, %v570_v35  ;;  %v827_v54 = vrot.slane %v1467_v37, 1 }
 0x11e   : > { %1396 = vmatmul.mubr.bf16.vlgmr.msra.gmra.mrb[8].mxu0 %v1224_v36  ;;  %v616_v38 = vshll.u32 %v1224_v36, 16  ;;  %v614_v40 = vshrl.u32 %v1224_v36, 16  ;;  %v623_v42 = vrot.slane %v621_v39, 1  ;;  %v826_v53 = vrot.slane %v1258_v51, 1 }
 0x120   : > { %v618_v41 = vrot.slane %v616_v38, 1  ;;  %v828_v55 = vsel %vm430_vm10, %v826_v53, %v827_v54 }
 0x122   : > { %v619_v15 = vor.u32 %v618_v41, %v614_v40 }
 0x124   : > { %v624_v7 = vsel %vm254_vm9, %v619_v15, %v623_v42 }
 0x125   : > { %1376 = vmatmul.mubr.bf16.vlgmr.msra.gmra.mrb[4].mxu1 %v624_v7 }
 0x126   : > { %1400 = vmatpush3.bf16.msra.mxu1 %v1468_v43  ;;  %1415 = vmatprep.mubr.msk.bf16.mxu1 %vm1486_vm0, %v1485_v1  ;;  %vm1045_vm0 = vcmask 1043459  }
 0x127   : > { %1401 = vmatprep.subr.bf16.mxu1 %v1485_v1 }
 0x12a   : > { %1402 = vmatpush3.bf16.msra.mxu1 %v1469_v44 }
 0x12b   : > { %1403 = vmatprep.subr.bf16.mxu1 %v1485_v1 }
 0x12e   : > { %1404 = vmatpush3.bf16.msra.mxu1 %v1470_v45 }
 0x12f   : > { %1405 = vmatprep.subr.bf16.mxu1 %v1485_v1 }
 0x132   : > { %1406 = vmatpush3.bf16.msra.mxu1 %v1471_v46 }
 0x133   : > { %1407 = vmatprep.subr.bf16.mxu1 %v1485_v1 }
 0x136   : > { %1408 = vmatpush3.bf16.msra.mxu1 %v1472_v47 }
 0x137   : > { %1409 = vmatprep.subr.bf16.mxu1 %v1485_v1 }
 0x13a   : > { %1410 = vmatpush3.bf16.msra.mxu1 %v1473_v48 }
 0x13b   : > { %1411 = vmatprep.subr.bf16.mxu1 %v1485_v1 }
 0x13e   : > { %1412 = vmatpush3.bf16.msra.mxu1 %v1474_v49 }
 0x13f   : > { %1413 = vmatprep.subr.bf16.mxu1 %v1485_v1  ;;  %v937_v1 = vunpack.c.0.s8 %v936_v4 }
 0x141   : > { %v940_v14 = vsub.s32 %v937_v1, %v939_v6 }
 0x142   : > { %1414 = vmatpush3.bf16.msra.mxu1 %v1475_v52 }
 0x145   : > { %1416 = vmatmul.mubr.bf16.vlgmr.msra.gmra.mrb[8].mxu1 %v828_v55 }
 0x1f1   : > { %v798_v56 = vpop.f32.mrb[8].mxu0 }
 0x1f2   : > { %v1397_v57 = vpop.f32.mrb[9].mxu0 }
 0x1f3   : > { %v801_v58 = vpop.f32.mrb[10].mxu0 }
 0x1f4   : > { %v1398_v59 = vpop.f32.mrb[11].mxu0 }
 0x1f8   : > { %v708_v60 = vpop.f32.mrb[4].mxu1 }
 0x1f9   : > { %v799_v61 = vadd.f32 %v798_v56, %v708_v60  ;;  %v1377_v62 = vpop.f32.mrb[5].mxu1 }
 0x1fa   : > { %v711_v63 = vpop.f32.mrb[6].mxu1 }
 0x1fb   : > { %v802_v0 = vadd.f32 %v801_v58, %v711_v63  ;;  %v1378_v2 = vpop.f32.mrb[7].mxu1 }
 0x218   : > { %v912_v8 = vpop.f32.mrb[8].mxu1 }
 0x219   : > { %v919_v10 = vadd.f32 %v912_v8, %v799_v61  ;;  %v1417_v11 = vpop.f32.mrb[9].mxu1 }
 0x21a   : > { %v915_v12 = vpop.f32.mrb[10].mxu1 }
 0x21b   : > { %v928_v13 = vadd.f32 %v1267_v9, %v919_v10  ;;  %v920_v16 = vadd.f32 %v915_v12, %v802_v0  ;;  %v1418_v17 = vpop.f32.mrb[11].mxu1 }
 0x21d   : > { %v930_v18 = vmax.f32 %v928_v13, 0.0  ;;  %v929_v19 = vadd.f32 %v1267_v9, %v920_v16 }
 0x21f   : > { %v934_v20 = vcombine.high %v930_v18, %v930_v18  ;;  %v941_v21 = vrot.slane %v930_v18, %v940_v14  ;;  %v931_v22 = vmax.f32 %v929_v19, 0.0 }
 0x221   : > { %v948_v23 = vrot.slane %v934_v20, %v940_v14  ;;  %v949_v24 = vcombine.high %v941_v21, %v941_v21  ;;  %v977_v25 = vsel %vm976_vm13, %v941_v21, -inf  ;;  %v951_v26 = vcombine.high %v931_v22, %v931_v22 }
 0x222   : > { %v978_v27 = vrot.slane %v977_v25, 4  ;;  %v958_v28 = vrot.slane %v931_v22, %v940_v14 }
 0x223   : > { %v950_v29 = vcombine.high %v948_v23, %v948_v23  ;;  %v984_v30 = vsel %vm976_vm13, %v949_v24, -inf  ;;  %v991_v31 = vsel %vm976_vm13, %v948_v23, -inf  ;;  %v965_v32 = vrot.slane %v951_v26, %v940_v14 }
 0x224   : > { %v979_v33 = vmax.f32 %v977_v25, %v978_v27  ;;  %v985_v34 = vrot.slane %v984_v30, 4  ;;  %v992_v35 = vrot.slane %v991_v31, 4  ;;  %v966_v36 = vcombine.high %v958_v28, %v958_v28 }
 0x225   : > { %v998_v37 = vsel %vm976_vm13, %v950_v29, -inf  ;;  %v967_v38 = vcombine.high %v965_v32, %v965_v32  ;;  %v1005_v39 = vsel %vm976_vm13, %v958_v28, -inf  ;;  %v1019_v40 = vsel %vm976_vm13, %v965_v32, -inf }
 0x226   : > { %v980_v41 = vrot.slane %v979_v33, 2  ;;  %v986_v15 = vmax.f32 %v984_v30, %v985_v34  ;;  %v993_v42 = vmax.f32 %v991_v31, %v992_v35  ;;  %v999_v43 = vrot.slane %v998_v37, 4 }
 0x227   : > { %v1006_v7 = vrot.slane %v1005_v39, 4  ;;  %v1012_v44 = vsel %vm976_vm13, %v966_v36, -inf  ;;  %v1020_v45 = vrot.slane %v1019_v40, 4  ;;  %v1026_v46 = vsel %vm976_vm13, %v967_v38, -inf }
 0x228   : > { %v981_v47 = vmax.f32 %v979_v33, %v980_v41  ;;  %v987_v48 = vrot.slane %v986_v15, 2  ;;  %v994_v49 = vrot.slane %v993_v42, 2  ;;  %v1000_v50 = vmax.f32 %v998_v37, %v999_v43 }
 0x229   : > { %v1007_v51 = vmax.f32 %v1005_v39, %v1006_v7  ;;  %v1013_v52 = vrot.slane %v1012_v44, 4  ;;  %v1021_v53 = vmax.f32 %v1019_v40, %v1020_v45  ;;  %v1027_v54 = vrot.slane %v1026_v46, 4 }
 0x22a   : > { %v982_v55 = vrot.slane %v981_v47, 1  ;;  %v988_v56 = vmax.f32 %v986_v15, %v987_v48  ;;  %v995_v57 = vmax.f32 %v993_v42, %v994_v49  ;;  %v1001_v58 = vrot.slane %v1000_v50, 2 }
 0x22b   : > { %v1008_v59 = vrot.slane %v1007_v51, 2  ;;  %v1014_v60 = vmax.f32 %v1012_v44, %v1013_v52  ;;  %v1022_v61 = vrot.slane %v1021_v53, 2  ;;  %v1028_v62 = vmax.f32 %v1026_v46, %v1027_v54 }
 0x22c   : > { %v989_v63 = vrot.slane %v988_v56, 1  ;;  %v996_v0 = vrot.slane %v995_v57, 1  ;;  %v1002_v2 = vmax.f32 %v1000_v50, %v1001_v58  ;;  %v983_v6 = vmax.f32 %v981_v47, %v982_v55 }
 0x22d   : > { %v1009_v3 = vmax.f32 %v1007_v51, %v1008_v59  ;;  %v1015_v4 = vrot.slane %v1014_v60, 2  ;;  %v1023_v5 = vmax.f32 %v1021_v53, %v1022_v61  ;;  %v1029_v1 = vrot.slane %v1028_v62, 2 }
 0x22e   : > { %v990_v8 = vmax.f32 %v988_v56, %v989_v63  ;;  %v997_v9 = vmax.f32 %v995_v57, %v996_v0  ;;  %v1003_v10 = vrot.slane %v1002_v2, 1 }
 0x22f   : > { %v1010_v11 = vrot.slane %v1009_v3, 1  ;;  %v1016_v12 = vmax.f32 %v1014_v60, %v1015_v4  ;;  %v1030_v13 = vmax.f32 %v1028_v62, %v1029_v1  ;;  %v1024_v16 = vrot.slane %v1023_v5, 1 }
 0x230   : > { %v1004_v14 = vmax.f32 %v1002_v2, %v1003_v10  ;;  %v1042_v17 = vsel %vm1041_vm14, %v990_v8, %v983_v6 }
 0x231   : > { %v1017_v18 = vrot.slane %v1016_v12, 1  ;;  %v1031_v19 = vrot.slane %v1030_v13, 1  ;;  %v1011_v20 = vmax.f32 %v1009_v3, %v1010_v11  ;;  %v1044_v21 = vsel %vm1043_vm15, %v997_v9, %v1042_v17 }
 0x232   : > { %v1046_v23 = vsel %vm1045_vm0, %v1004_v14, %v1044_v21  ;;  %v1025_v24 = vmax.f32 %v1023_v5, %v1024_v16 }
 0x233   : > { %v1018_v22 = vmax.f32 %v1016_v12, %v1017_v18  ;;  %v1048_v25 = vsel %vm1047_vm1, %v1011_v20, %v1046_v23  ;;  %v1032_v26 = vmax.f32 %v1030_v13, %v1031_v19 }
 0x235   : > { %v1050_v27 = vsel %vm1049_vm2, %v1018_v22, %v1048_v25 }
 0x236   : > { %v1052_v28 = vsel %vm1051_vm3, %v1025_v24, %v1050_v27 }
 0x237   : > { %v1054_v29 = vsel %vm1053_vm4, %v1032_v26, %v1052_v28 }
 0x238   : > { %1056 = vrot.lane.b32.xlu0 %v1054_v29, %s1488_s12 }
 0x2aa   : > { %v1057_v30 = vpop.permute.xlu0 %1056 }
 0x2ab   : > { %v1059_v31 = vrot.slane %v1057_v30, 1  ;;  %v1060_v32 = vrot.slane %v1057_v30, 2  ;;  %v1061_v33 = vrot.slane %v1057_v30, 3  ;;  %v1062_v34 = vrot.slane %v1057_v30, 4 }
 0x2ac   : > { %v1063_v35 = vrot.slane %v1057_v30, 5  ;;  %v1064_v36 = vrot.slane %v1057_v30, 6  ;;  %v1065_v37 = vrot.slane %v1057_v30, 7  ;;  %v1074_v15 = vmax.f32 %v983_v6, %v1057_v30 }
 0x2ad   : > { %v1075_v38 = vmax.f32 %v990_v8, %v1059_v31  ;;  %v1076_v39 = vmax.f32 %v997_v9, %v1060_v32  ;;  %v1077_v40 = vmax.f32 %v1004_v14, %v1061_v33  ;;  %v1078_v41 = vmax.f32 %v1011_v20, %v1062_v34 }
 0x2ae   : > { %v1079_v42 = vmax.f32 %v1018_v22, %v1063_v35  ;;  %v1080_v44 = vmax.f32 %v1025_v24, %v1064_v36  ;;  %v1081_v45 = vmax.f32 %v1032_v26, %v1065_v37 }
 0x2af   : > { %v1090_v43 = vrot.slane %v1075_v38, 7  ;;  %v1092_v7 = vrot.slane %v1076_v39, 6  ;;  %v1094_v47 = vrot.slane %v1077_v40, 5  ;;  %v1096_v49 = vrot.slane %v1078_v41, 4 }
 0x2b0   : > { %v1098_v51 = vrot.slane %v1079_v42, 3  ;;  %v1100_v53 = vrot.slane %v1080_v44, 2  ;;  %v1102_v55 = vrot.slane %v1081_v45, 1 }
 0x2b1   : > { %v1091_v46 = vsel %vm1041_vm14, %v1090_v43, %v1074_v15 }
 0x2b2   : > { %v1093_v48 = vsel %vm1043_vm15, %v1092_v7, %v1091_v46 }
 0x2b3   : > { %v1095_v50 = vsel %vm1045_vm0, %v1094_v47, %v1093_v48 }
 0x2b4   : > { %v1097_v52 = vsel %vm1047_vm1, %v1096_v49, %v1095_v50 }
 0x2b5   : > { %v1099_v54 = vsel %vm1049_vm2, %v1098_v51, %v1097_v52 }
 0x2b6   : > { %v1101_v56 = vsel %vm1051_vm3, %v1100_v53, %v1099_v54 }
 0x2b7   : > { %v1103_v57 = vsel %vm1053_vm4, %v1102_v55, %v1101_v56 }
 0x2b8   : > { %1105 = vst [vmem:[%s222_s16] sm:$0xff] %v1103_v57 }
 0x2b9 PF: > { %s15_s18 = sadd.s32 1, %s1483_s18  }
 0x2ba   : > { %p12_p4 = scmp.ge.s32.totalorder %s15_s18, 4  }
 0x2bc   :  { %14 = sbr.rel (!%p12_p4) target bundleno = 1 (0x1), region = 74 }

</bundles_post_ra>
